<compile_context>
chip_gen: v7x
topology: tpu7x:2x2x1
jax: 0.10.0
libtpu: 0.0.40
codegen_flags: <defaults>
</compile_context>

<pallas_src>
import math

import jax
import jax.numpy as jnp
from jax.experimental import pallas as pl
from jax.experimental.pallas import tpu as pltpu

_LANE = 128
_ACC_ROWS = 32                        # VMEM accumulator depth (multiple of 8)
_TILE_BYTES = 4 * 1024 * 1024         # ~4 MiB HBM per input tile, any dtype
_VMEM_LIMIT_BYTES = 40 * 1024 * 1024  # explicit scoped-VMEM limit (all chips)
_MEAN_SMALL = 4 * 8 * _LANE           # below this, jnp.mean beats a kernel launch


def _cdiv(a, b):
    return -(-a // b)


def _round_up(x, m):
    return _cdiv(x, m) * m


def _plan_tiles(total, itemsize, n_splits):
    """Lane-dense tiling plan -> (tile_rows, n_tiles, rows_padded).

    Tiles are ~_TILE_BYTES of HBM traffic each (dtype-scaled row count) and
    balanced across the real tile count, so padding is < _ACC_ROWS * n_tiles
    rows per tensor.  n_tiles is a multiple of n_splits.
    """
    rows = max(1, _cdiv(total, _LANE))
    max_rows = max(_ACC_ROWS,
                   (_TILE_BYTES // (_LANE * itemsize)) // _ACC_ROWS * _ACC_ROWS)
    n_tiles = _round_up(max(n_splits, _cdiv(rows, max_rows)), n_splits)
    tile_rows = _round_up(_cdiv(rows, n_tiles), _ACC_ROWS)
    return tile_rows, n_tiles, tile_rows * n_tiles


def _to_lane_dense(x2d, rows_p):
    """(B, total) -> (B, rows_p, 128), zero-padding only if needed.

    Zero padding is applied identically to both operands of a difference, so
    it contributes nothing to the sum of squared errors (and nothing to a
    plain sum); wrappers divide by the true element count.
    """
    b, total = x2d.shape
    pad = rows_p * _LANE - total
    if pad:
        x2d = jnp.pad(x2d, ((0, 0), (0, pad)))
    return x2d.reshape(b, rows_p, _LANE)


# ----------------------------------------------------------------------------
# PSNR kernel: grid = (N images, splits, tiles); resident (32, 128) f32 VMEM
# accumulator; lane-dense partial-SSE output written on the last tile of each
# (image, split).  Final mse/psnr scalar math happens in the wrapper.
# ----------------------------------------------------------------------------
def _psnr_kernel(a_ref, b_ref, psum_ref, acc_ref):
    t = pl.program_id(2)

    @pl.when(t == 0)
    def _init():
        acc_ref[...] = jnp.zeros_like(acc_ref)

    # Native-dtype blocks are cast here (VPU); DMA stays narrow for bf16/u8.
    a = a_ref[0].astype(jnp.float32)            # (tile_rows, 128)
    b = b_ref[0].astype(jnp.float32)
    d = a - b                                    # 255^2 scale hoisted to wrapper
    sq = d * d
    # Fold into (tile_rows//32, 32, 128) groups and add to the resident
    # accumulator: pure element-wise VPU work, independent partial sums.
    acc_ref[...] += sq.reshape(sq.shape[0] // _ACC_ROWS, _ACC_ROWS, _LANE).sum(axis=0)

    @pl.when(t == pl.num_programs(2) - 1)
    def _finalize():
        # Single cross-lane reduce; lane-dense (1, 1, 128) store (no vst.msk).
        psum_ref[...] = jnp.full(psum_ref.shape, jnp.sum(acc_ref[...]), jnp.float32)


def calculate_psnr_batched(img1, img2):
    """PSNR/MSE for a batch of (N, ...) image pairs in [0, 1].

    Returns (psnr, mse), both f32 arrays of shape (N,). One pallas_call for
    the whole batch; images stream as lane-dense ~4 MiB (dtype-scaled) tiles.
    When N == 1 the tile range is split across two "parallel" grid slots so a
    v7x megacore uses both TensorCores.
    """
    assert img1.shape == img2.shape, (img1.shape, img2.shape)
    n = img1.shape[0]
    per_img = math.prod(img1.shape[1:])
    itemsize = jnp.dtype(img1.dtype).itemsize
    rows = max(1, _cdiv(per_img, _LANE))

    n_splits = 2 if (n == 1 and rows >= 2 * _ACC_ROWS) else 1
    tile_rows, n_tiles, rows_p = _plan_tiles(per_img, itemsize, n_splits)
    tps = n_tiles // n_splits   # tiles per (image, split)

    a3 = _to_lane_dense(img1.reshape(n, per_img), rows_p)
    b3 = _to_lane_dense(img2.reshape(n, per_img), rows_p)

    cost = pl.CostEstimate(
        flops=3 * n * per_img,
        transcendentals=0,
        bytes_accessed=2 * n * per_img * itemsize + 4 * n * n_splits * _LANE,
    )

    psum = pl.pallas_call(
        _psnr_kernel,
        out_shape=jax.ShapeDtypeStruct((n * n_splits, 1, _LANE), jnp.float32),
        grid=(n, n_splits, tps),
        in_specs=[
            pl.BlockSpec((1, tile_rows, _LANE), lambda i, s, t: (i, s * tps + t, 0)),
            pl.BlockSpec((1, tile_rows, _LANE), lambda i, s, t: (i, s * tps + t, 0)),
        ],
        out_specs=pl.BlockSpec((1, 1, _LANE), lambda i, s, t: (i * n_splits + s, 0, 0)),
        scratch_shapes=[pltpu.VMEM((_ACC_ROWS, _LANE), jnp.float32)],
        compiler_params=pltpu.CompilerParams(
            dimension_semantics=("parallel", "parallel", "arbitrary"),
            vmem_limit_bytes=_VMEM_LIMIT_BYTES),
        cost_estimate=cost,
    )(a3, b3)

    sse = psum[:, 0, 0].reshape(n, n_splits).sum(axis=1)
    mse = sse * jnp.float32(255.0 * 255.0) / jnp.float32(per_img)
    safe_mse = jnp.maximum(mse, jnp.float32(1e-20))
    psnr = 10.0 * jnp.log10(jnp.float32(255.0 * 255.0) / safe_mse)
    psnr = jnp.where(mse > 0.0, psnr, jnp.float32(jnp.inf))   # identical images
    return psnr, mse


def calculate_psnr_pallas(img1, img2):
    """Single (C, H, W) pair -> (psnr, mse) f32 scalars (matches torch API)."""
    psnr, mse = calculate_psnr_batched(img1[None], img2[None])
    return psnr[0], mse[0]


# ----------------------------------------------------------------------------
# mean() path for _parse_losses: tiny tensors use jnp.mean (a pallas_call
# launch would dominate); large ones use a lane-dense tiled Pallas sum.
# ----------------------------------------------------------------------------
def _sum_kernel(x_ref, o_ref, acc_ref):
    t = pl.program_id(0)

    @pl.when(t == 0)
    def _init():
        acc_ref[...] = jnp.zeros_like(acc_ref)

    x = x_ref[...].astype(jnp.float32)          # (tile_rows, 128)
    acc_ref[...] += x.reshape(x.shape[0] // _ACC_ROWS, _ACC_ROWS, _LANE).sum(axis=0)

    @pl.when(t == pl.num_programs(0) - 1)
    def _finalize():
        o_ref[...] = jnp.full(o_ref.shape, jnp.sum(acc_ref[...]), jnp.float32)


def mean_pallas(x):
    """Equivalent of tensor.mean() in f32."""
    x = jnp.asarray(x)
    total = x.size
    if total == 0:
        # torch .mean() of an empty tensor is NaN; keep parity explicitly.
        return jnp.float32(jnp.nan)
    if total <= _MEAN_SMALL:
        # Launch + pad/reshape overhead would dominate the reduction.
        return jnp.mean(x.astype(jnp.float32))

    itemsize = jnp.dtype(x.dtype).itemsize
    tile_rows, n_tiles, rows_p = _plan_tiles(total, itemsize, 1)
    x2 = _to_lane_dense(x.reshape(1, total), rows_p)[0]     # (rows_p, 128)

    s = pl.pallas_call(
        _sum_kernel,
        out_shape=jax.ShapeDtypeStruct((1, _LANE), jnp.float32),
        grid=(n_tiles,),
        in_specs=[pl.BlockSpec((tile_rows, _LANE), lambda t: (t, 0))],
        out_specs=pl.BlockSpec((1, _LANE), lambda t: (0, 0)),
        scratch_shapes=[pltpu.VMEM((_ACC_ROWS, _LANE), jnp.float32)],
        compiler_params=pltpu.CompilerParams(
            dimension_semantics=("arbitrary",),
            vmem_limit_bytes=_VMEM_LIMIT_BYTES),
    )(x2)
    return s[0, 0] / jnp.float32(total)


# ----------------------------------------------------------------------------
# Module port (glue mirrors the PyTorch control flow)
# ----------------------------------------------------------------------------
class BaseCompressorPallas:
    """JAX/Pallas port of the concrete numeric pieces of BaseCompressor."""

    def forward(self, img, img_metas, return_loss=True, return_image=False, **kwargs):
        if return_loss:
            return self.forward_train(img, img_metas, **kwargs)
        return self.forward_test(img, img_metas, return_image, **kwargs)

    def forward_train(self, img, img_metas, **kwargs):
        # TODO(synk): abstract in the reference module; no concrete compute to port.
        raise NotImplementedError

    def forward_test(self, img, img_metas, return_image=False, **kwargs):
        # TODO(synk): abstract in the reference module; no concrete compute to port.
        raise NotImplementedError

    @staticmethod
    def calculate_bits_num(bitstreams):
        return sum(len(v) * 8 for v in bitstreams.values())

    @staticmethod
    def calculate_psnr(img1, img2):
        psnr, _ = calculate_psnr_pallas(img1, img2)
        return psnr

    @staticmethod
    def _parse_losses(losses):
        # TODO(synk): torch.distributed all_reduce branch omitted (single host).
        log_vars = {}
        for name, value in losses.items():
            if isinstance(value, (list, tuple)):
                log_vars[name] = sum(mean_pallas(v) for v in value)
            else:
                log_vars[name] = mean_pallas(value)
        loss = sum(v for k, v in log_vars.items() if "loss" in k)
        log_vars["loss"] = loss
        # Single host transfer for all logged scalars (instead of per-value .item()).
        keys = list(log_vars.keys())
        vals = jax.device_get(
            jnp.stack([jnp.asarray(log_vars[k], jnp.float32) for k in keys]))
        log_vars = {k: float(v) for k, v in zip(keys, vals)}
        return loss, log_vars


# ----------------------------------------------------------------------------
# Demo / self-check
# ----------------------------------------------------------------------------
if __name__ == "__main__":
    key = jax.random.PRNGKey(0)
    k1, k2, k3, k4, k5, k6, k7 = jax.random.split(key, 7)
    N, C, H, W = 2, 4, 16, 16

    img = jax.random.uniform(k1, (N, C, H, W), dtype=jnp.float32)
    noise = 0.02 * jax.random.normal(k2, (N, C, H, W), dtype=jnp.float32)
    rec = jnp.clip(img + noise, 0.0, 1.0)  # stand-in for compress->decompress

    model = BaseCompressorPallas()

    # Batched PSNR: one pallas_call for the whole batch.
    psnr_arr, mse_arr = calculate_psnr_batched(img, rec)
    psnr_arr = jax.block_until_ready(psnr_arr)
    mse_arr = jax.block_until_ready(mse_arr)

    ref_mse = jnp.mean(((img - rec) * 255.0) ** 2, axis=(1, 2, 3))
    ref_psnr = 10.0 * jnp.log10(255.0 ** 2 / ref_mse)
    assert jnp.allclose(mse_arr, ref_mse, rtol=1e-4, atol=1e-2), (mse_arr, ref_mse)
    assert jnp.allclose(psnr_arr, ref_psnr, rtol=1e-4, atol=1e-3), (psnr_arr, ref_psnr)

    # Single-image static-method path (mirrors the torch signature).
    p0 = jax.block_until_ready(model.calculate_psnr(img[0], rec[0]))
    assert jnp.allclose(p0, ref_psnr[0], rtol=1e-4, atol=1e-3)

    # Single image large enough to take the 2-way split (v7x dual-TC) branch.
    big_a = jax.random.uniform(k5, (3, 64, 128), dtype=jnp.float32)
    big_b = jnp.clip(big_a + 0.03 * jax.random.normal(k6, (3, 64, 128)), 0.0, 1.0)
    p_big, m_big = calculate_psnr_pallas(big_a, big_b)
    ref_m_big = jnp.mean(((big_a - big_b) * 255.0) ** 2)
    ref_p_big = 10.0 * jnp.log10(255.0 ** 2 / ref_m_big)
    assert jnp.allclose(jax.block_until_ready(m_big), ref_m_big, rtol=1e-4, atol=1e-2)
    assert jnp.allclose(jax.block_until_ready(p_big), ref_p_big, rtol=1e-4, atol=1e-3)

    # Identical images: MSE == 0, PSNR == +inf (no NaN).
    p_same, m_same = calculate_psnr_pallas(img[0], img[0])
    assert float(jax.block_until_ready(m_same)) == 0.0
    assert bool(jnp.isinf(jax.block_until_ready(p_same)))

    # Native-dtype path: bf16 DMA'd as-is, cast in-kernel (no wrapper upcast).
    img_bf, rec_bf = img.astype(jnp.bfloat16), rec.astype(jnp.bfloat16)
    psnr_bf, mse_bf = calculate_psnr_batched(img_bf, rec_bf)
    ref_mse_bf = jnp.mean(
        ((img_bf.astype(jnp.float32) - rec_bf.astype(jnp.float32)) * 255.0) ** 2,
        axis=(1, 2, 3))
    assert jnp.allclose(jax.block_until_ready(mse_bf), ref_mse_bf, rtol=1e-3, atol=1e-1)

    # Unaligned shape exercises the zero-padding path.
    a_small = jax.random.uniform(k3, (3, 5, 7), dtype=jnp.float32)
    b_small = jnp.clip(a_small + 0.05 * jax.random.normal(k4, (3, 5, 7)), 0.0, 1.0)
    p_s, m_s = calculate_psnr_pallas(a_small, b_small)
    ref_m_s = jnp.mean(((a_small - b_small) * 255.0) ** 2)
    assert jnp.allclose(jax.block_until_ready(m_s), ref_m_s, rtol=1e-4, atol=1e-2)

    # _parse_losses: tiny tensors -> jnp.mean; one large unaligned tensor
    # exercises the Pallas tiled sum kernel.
    big_loss = jax.random.uniform(k7, (3, 333, 257), dtype=jnp.float32)
    losses = {
        "loss_mse": mse_arr / (255.0 * 255.0),
        "psnr": psnr_arr,
        "loss_aux": [mse_arr * 0.0 + 0.5, mse_arr * 0.0 + 0.25],
        "loss_big": big_loss,
    }
    loss, log_vars = model._parse_losses(losses)
    jax.block_until_ready(jnp.asarray(loss))
    assert jnp.allclose(jnp.asarray(log_vars["loss_mse"]),
                        jnp.mean(ref_mse) / 255.0 ** 2, rtol=1e-4)
    assert abs(log_vars["loss_aux"] - 0.75) < 1e-5
    assert abs(log_vars["loss_big"] - float(jnp.mean(big_loss))) < 1e-4
    assert abs(log_vars["loss"] - (log_vars["loss_mse"] + log_vars["loss_aux"]
                                   + log_vars["loss_big"])) < 1e-4

    print("KERNEL_OK")
</pallas_src>

<mosaic_0001>
module attributes {stable_mosaic.version = 11 : i64} {
  func.func @_psnr_kernel(%arg0: i32, %arg1: i32, %arg2: i32, %arg3: memref<1x32x128xf32, #tpu.memory_space<vmem>>, %arg4: memref<1x32x128xf32, #tpu.memory_space<vmem>>, %arg5: memref<1x1x128xf32, #tpu.memory_space<vmem>>, %arg6: memref<32x128xf32, #tpu.memory_space<vmem>>) attributes {dimension_semantics = [#tpu.dimension_semantics<parallel>, #tpu.dimension_semantics<parallel>, #tpu.dimension_semantics<arbitrary>], iteration_bounds = array<i64: 2, 1, 1>, scalar_prefetch = 0 : i64, scratch_operands = 1 : i64, tpu.core_type = #tpu.core_type<tc>, window_params = [{transform_indices = @transform_0, window_bounds = array<i64: 1, 32, 128>}, {transform_indices = @transform_1, window_bounds = array<i64: 1, 32, 128>}, {transform_indices = @transform_2, window_bounds = array<i64: 1, 1, 128>}]} {
    %c0_i32 = arith.constant 0 : i32
    %0 = arith.cmpi eq, %arg2, %c0_i32 : i32
    %1 = arith.extui %0 : i1 to i32
    %c0_i32_0 = arith.constant 0 : i32
    %2 = arith.cmpi ne, %1, %c0_i32_0 : i32
    scf.if %2 {
      %cst_12 = arith.constant 0.000000e+00 : f32
      %17 = vector.broadcast %cst_12 : f32 to vector<32x128xf32>
      %c0_13 = arith.constant 0 : index
      %c0_14 = arith.constant 0 : index
      %18 = vector.load %arg6[%c0_13, %c0_14] : memref<32x128xf32, #tpu.memory_space<vmem>>, vector<32x128xf32>
      tpu.vector_store %arg6[%c0_13, %c0_14], %17 {strides = array<i32>} : memref<32x128xf32, #tpu.memory_space<vmem>>, vector<32x128xf32>,
    } else {
    }
    %c0 = arith.constant 0 : index
    %c0_1 = arith.constant 0 : index
    %c0_2 = arith.constant 0 : index
    %3 = vector.load %arg3[%c0, %c0_1, %c0_2] : memref<1x32x128xf32, #tpu.memory_space<vmem>>, vector<1x32x128xf32>
    %4 = vector.shape_cast %3 : vector<1x32x128xf32> to vector<32x128xf32>
    %c0_3 = arith.constant 0 : index
    %c0_4 = arith.constant 0 : index
    %c0_5 = arith.constant 0 : index
    %5 = vector.load %arg4[%c0_3, %c0_4, %c0_5] : memref<1x32x128xf32, #tpu.memory_space<vmem>>, vector<1x32x128xf32>
    %6 = vector.shape_cast %5 : vector<1x32x128xf32> to vector<32x128xf32>
    %7 = arith.subf %4, %6 : vector<32x128xf32>
    %8 = arith.mulf %7, %7 : vector<32x128xf32>
    %c0_6 = arith.constant 0 : index
    %c0_7 = arith.constant 0 : index
    %9 = vector.load %arg6[%c0_6, %c0_7] : memref<32x128xf32, #tpu.memory_space<vmem>>, vector<32x128xf32>
    %10 = vector.shape_cast %8 : vector<32x128xf32> to vector<1x32x128xf32>
    %cst = arith.constant dense<0.000000e+00> : vector<32x128xf32>
    %11 = vector.multi_reduction <add>, %10, %cst [0] : vector<1x32x128xf32> to vector<32x128xf32>
    %12 = arith.addf %9, %11 : vector<32x128xf32>
    %c0_8 = arith.constant 0 : index
    %c0_9 = arith.constant 0 : index
    %13 = vector.load %arg6[%c0_8, %c0_9] : memref<32x128xf32, #tpu.memory_space<vmem>>, vector<32x128xf32>
    tpu.vector_store %arg6[%c0_8, %c0_9], %12 {strides = array<i32>} : memref<32x128xf32, #tpu.memory_space<vmem>>, vector<32x128xf32>,
    %c0_i32_10 = arith.constant 0 : i32
    %14 = arith.cmpi eq, %arg2, %c0_i32_10 : i32
    %15 = arith.extui %14 : i1 to i32
    %c0_i32_11 = arith.constant 0 : i32
    %16 = arith.cmpi ne, %15, %c0_i32_11 : i32
    scf.if %16 {
      %c0_12 = arith.constant 0 : index
      %c0_13 = arith.constant 0 : index
      %17 = vector.load %arg6[%c0_12, %c0_13] : memref<32x128xf32, #tpu.memory_space<vmem>>, vector<32x128xf32>
      %18 = vector.shape_cast %17 : vector<32x128xf32> to vector<1x32x128xf32>
      %cst_14 = arith.constant dense<0.000000e+00> : vector<1xf32>
      %19 = vector.multi_reduction <add>, %18, %cst_14 [1, 2] : vector<1x32x128xf32> to vector<1xf32>
      %20 = vector.shape_cast %19 : vector<1xf32> to vector<1x1x1xf32>
      %21 = vector.extract %20[0, 0, 0] : f32 from vector<1x1x1xf32>
      %22 = vector.broadcast %21 : f32 to vector<1x1x128xf32>
      %c0_15 = arith.constant 0 : index
      %c0_16 = arith.constant 0 : index
      %c0_17 = arith.constant 0 : index
      %23 = vector.load %arg5[%c0_15, %c0_16, %c0_17] : memref<1x1x128xf32, #tpu.memory_space<vmem>>, vector<1x1x128xf32>
      tpu.vector_store %arg5[%c0_15, %c0_16, %c0_17], %22 {strides = array<i32>} : memref<1x1x128xf32, #tpu.memory_space<vmem>>, vector<1x1x128xf32>,
    } else {
    }
    return
  }
  func.func @transform_0(%arg0: i32, %arg1: i32, %arg2: i32) -> (i32, i32, i32) {
    %c1_i32 = arith.constant 1 : i32
    %0 = arith.muli %arg1, %c1_i32 : i32
    %1 = arith.addi %0, %arg2 : i32
    %c0_i32 = arith.constant 0 : i32
    %c0_i32_0 = arith.constant 0 : i32
    return %arg0, %1, %c0_i32 : i32, i32, i32
  }
  func.func @transform_1(%arg0: i32, %arg1: i32, %arg2: i32) -> (i32, i32, i32) {
    %c1_i32 = arith.constant 1 : i32
    %0 = arith.muli %arg1, %c1_i32 : i32
    %1 = arith.addi %0, %arg2 : i32
    %c0_i32 = arith.constant 0 : i32
    %c0_i32_0 = arith.constant 0 : i32
    return %arg0, %1, %c0_i32 : i32, i32, i32
  }
  func.func @transform_2(%arg0: i32, %arg1: i32, %arg2: i32) -> (i32, i32, i32) {
    %c1_i32 = arith.constant 1 : i32
    %0 = arith.muli %arg0, %c1_i32 : i32
    %1 = arith.addi %0, %arg1 : i32
    %c0_i32 = arith.constant 0 : i32
    %c0_i32_0 = arith.constant 0 : i32
    %c0_i32_1 = arith.constant 0 : i32
    return %1, %c0_i32, %c0_i32_0 : i32, i32, i32
  }
}

</mosaic_0001>

<bundles_post_ra>
// kernel: tpu_custom_call.1
= control target key start
LH: loop header
LB: loop body
LE: loop exit
PB: predicated region body
PF: predicated region fallthrough
CT: control target
= control target key end

     0   :  { %7 = vsyncpa [#allocation4], 0  ;;  %s917_s0 = inlined_call_operand.hbm [shape: f32[2,32,128], index: 0, kind: input, shape index: {}]   ;;  %s918_s1 = inlined_call_operand.hbm [shape: f32[2,32,128], index: 1, kind: input, shape index: {}]   ;;  %s919_s2 = inlined_call_operand.hbm [shape: f32[2,1,128], index: 2, kind: output, shape index: {}]  }
   0x1   :  { %9 = vsyncpa [#allocation4 + $0x1], 0 }
   0x2   :  { %10 = vsyncpa [#allocation7], 0 }
   0x3   :  { %12 = vsyncpa [#allocation7 + $0x1], 0 }
   0x4   :  { %13 = vsyncpa [#allocation5], 0 }
   0x5   :  { %15 = vsyncpa [#allocation5 + $0x1], 0  ;;  %s682_s9 = smov 0   ;;  %s684_s10 = smov 0  }
   0x6   :  { %s686_s11 = smov 0   ;;  %s688_s12 = smov 0  }
   0x7   :  { %s690_s13 = smov 0   ;;  %s692_s14 = smov 0  }
   0x8 LB: > { %s425_s15 = sadd.s32 4294967295, %s660_s14   ;;  %s426_s16 = sadd.s32 4294967294, %s660_s14   ;;  %s660_s14 = sphi %s692_s14, %s21_s14   ;;  %s656_s13 = sphi %s690_s13, %s937_s13   ;;  %s652_s12 = sphi %s688_s12, %s936_s12   ;;  %s648_s11 = sphi %s686_s11, %s935_s11   ;;  %s644_s10 = sphi %s684_s10, %s934_s10   ;;  %s640_s9 = sphi %s682_s9, %s933_s9  }
   0x9   : > { %s40_s17 = sadd.s32 1, %s656_s13  ;;  %s51_s18 = sadd.s32 1, %s648_s11 }
   0xa   : > { %p42_p0 = scmp.ge.s32.totalorder %s40_s17, 2  ;;  %p58_p1 = scmp.ne.s32.totalorder %s648_s11, %s644_s10 }
   0xb   : > { %p59_p2 = scmp.eq.s32.totalorder %s660_s14, 0  ;;  %p64_p3 = scmp.ne.s32.totalorder %s644_s10, %s640_s9 }
   0xc   : > { %s939_s17 = smov (%p42_p0, %s40_s17), 0  ;;  %p65_p5 = scmp.eq.s32.totalorder %s425_s15, 0 }
   0xd   : > { %p723_p4 = por %p59_p2, %p58_p1  ;;  %s46_s20 = ssub.s32 %s656_s13, %s939_s17 }
   0xe   : > { %p120_p6 = scmp.eq.s32.totalorder %s425_s15, 1  ;;  %p49_p7 = scmp.eq.s32.totalorder %s46_s20, 0 }
   0xf   : > { %p729_p8 = por %p65_p5, %p64_p3  ;;  %p126_p10 = scmp.eq.s32.totalorder %s426_s16, 1 }
  0x10   : > { %p733_p9 = por %p120_p6, %p58_p1  ;;  %p462_p13 = scmp.lt.s32.totalorder %s660_s14, 2 }
  0x11   : > { %s923_s21 = scalar_select %p729_p8, 1, 0 }
  0x12   : > { %s924_s22 = scalar_select %p733_p9, 1, 0 }
  0x13   : > { %s738_s23 = scalar_select %p49_p7, %s648_s11, %s51_s18  }
  0x14   : > { %p740_p11 = por %p126_p10, %p64_p3  ;;  %s747_s25 = sand.u32 1, %s648_s11  }
  0x15   : > { %s429_s26 = sshll.u32 %s747_s25, 5  ;;  %s441_s27 = sshll.u32 %s656_s13, 9 }
  0x16   : > { %s925_s24 = scalar_select %p740_p11, 1, 0 }
  0x17   : > { %s756_s30 = scalar_lea.hbm %s917_s0, %s441_s27  ;;  %s150_s3 = scalar_lea.vmem [#allocation3], %s429_s26 }
  0x18   : > { %s160_s4 = sshll.u32 %s150_s3, 4  ;;  %p764_p0 = pnand %p462_p13, %p723_p4  ;;  %s760_s4 = int_to_ptr.vmem [resolvable:$true] %s160_s4 }
  0x19   : > { %s147_s6 = scalar_lea.sflag [#allocation4], %s747_s25  ;;  %s514_s7 = scalar_lea.hbm %s756_s30, 512 }
  0x1a   : > { %p515_p2 = scmp.ne.s32.totalorder %s756_s30, %s514_s7  ;;  %p516_p3 = pneg %p764_p0 }
  0x1b   : > { %s519_s16 = scalar_lea.hbm %s917_s0, 1024  ;;  %p520_p4 = scmp.lt.u32.totalorder %s756_s30, %s917_s0 }
  0x1c   : > { %p517_p5 = pnand %p516_p3, %p515_p2  ;;  %p521_p7 = scmp.lt.u32.totalorder %s519_s16, %s514_s7 }
  0x1d   : > { %p523_p13 = scmp.lt.u32.totalorder %s514_s7, %s756_s30 }
  0x1e   : > { %p518_p6 = pneg %p517_p5  ;;  %p522_p10 = por %p521_p7, %p520_p4 }
  0x20   : > { %p524_p12 = por %p523_p13, %p522_p10 }
  0x22   : > { %p525_p1 = pnand %p524_p12, %p518_p6 }
  0x24   : > { %528 = shalt.err (!%p525_p1)
}
  0x25   : > { %s529_s20 = scalar_lea.vmem %s760_s4, 512  ;;  %s662_s28 = smov [#allocation3]  }
  0x26   : > { %p530_p2 = scmp.ne.s32.totalorder %s760_s4, %s529_s20  ;;  %s534_s29 = sshll.u32 %s662_s28, 4  ;;  %s535_s29 = int_to_ptr.vmem [resolvable:$false] %s534_s29 }
  0x27   : > { %s536_s3 = scalar_lea.vmem %s535_s29, 1024  ;;  %p537_p9 = scmp.lt.s32.totalorder %s760_s4, %s535_s29 }
  0x28   : > { %p532_p5 = pnand %p530_p2, %p516_p3  ;;  %p538_p4 = scmp.lt.s32.totalorder %s536_s3, %s529_s20 }
  0x2a   : > { %p533_p11 = pneg %p532_p5  ;;  %p539_p7 = por %p538_p4, %p537_p9 }
  0x2c   : > { %p540_p10 = pnand %p539_p7, %p533_p11 }
  0x2e   : > { %543 = shalt.err (!%p540_p10)
}
  0x2f   : > { %s663_s7 = smov 128   ;;  %s664_s8 = smov 8  }
  0x30   : > { %454 = dma.hbm_to_vmem [thread:$0]  (!%p764_p0), %s756_s30, 512, %s760_s4, %s147_s6, %s663_s7, %s663_s7, %s664_s8  }
  0x31   : > { %p192_p9 = scmp.lt.s32.totalorder %s660_s14, 3  ;;  %s806_s18 = scalar_lea.hbm %s918_s1, %s441_s27 }
  0x32   : > { %p927_p11 = scmp.ge.s32.totalorder %s660_s14, 1  ;;  %s174_s20 = scalar_lea.vmem [#allocation6], %s429_s26 }
  0x33   : > { %s184_s28 = sshll.u32 %s174_s20, 4  ;;  %s171_s30 = scalar_lea.sflag [#allocation7], %s747_s25  ;;  %s816_s28 = int_to_ptr.vmem [resolvable:$true] %s184_s28 }
  0x34   : > { %p810_p12 = pnand %p927_p11, %p192_p9  ;;  %s544_s4 = scalar_lea.hbm %s806_s18, 512 }
  0x35   : > { %p545_p1 = scmp.ne.s32.totalorder %s806_s18, %s544_s4  ;;  %s549_s29 = scalar_lea.hbm %s918_s1, 1024 }
  0x36   : > { %p550_p2 = scmp.lt.u32.totalorder %s806_s18, %s918_s1  ;;  %p551_p5 = scmp.lt.u32.totalorder %s549_s29, %s544_s4 }
  0x37   : > { %p547_p6 = pnand %p545_p1, %p516_p3  ;;  %p553_p7 = scmp.lt.u32.totalorder %s544_s4, %s806_s18 }
  0x38   : > { %p552_p4 = por %p551_p5, %p550_p2 }
  0x39   : > { %p548_p13 = pneg %p547_p6 }
  0x3a   : > { %p554_p10 = por %p553_p7, %p552_p4 }
  0x3c   : > { %p555_p9 = pnand %p554_p10, %p548_p13 }
  0x3e   : > { %558 = shalt.err (!%p555_p9)
}
  0x3f   : > { %s559_s26 = scalar_lea.vmem %s816_s28, 512  ;;  %s665_s16 = smov [#allocation6]  }
  0x40   : > { %p560_p11 = scmp.ne.s32.totalorder %s816_s28, %s559_s26  ;;  %s564_s20 = sshll.u32 %s665_s16, 4  ;;  %s565_s20 = int_to_ptr.vmem [resolvable:$false] %s564_s20 }
  0x41   : > { %s566_s27 = scalar_lea.vmem %s565_s20, 1024  ;;  %p567_p8 = scmp.lt.s32.totalorder %s816_s28, %s565_s20 }
  0x42   : > { %p562_p1 = pnand %p560_p11, %p516_p3  ;;  %p568_p2 = scmp.lt.s32.totalorder %s566_s27, %s559_s26 }
  0x44   : > { %p563_p6 = pneg %p562_p1  ;;  %p569_p5 = por %p568_p2, %p567_p8 }
  0x46   : > { %p570_p4 = pnand %p569_p5, %p563_p6 }
  0x48   : > { %573 = shalt.err (!%p570_p4)
}
  0x49   : > { %457 = dma.hbm_to_vmem [thread:$0]  (!%p764_p0), %s806_s18, 512, %s816_s28, %s171_s30, %s663_s7, %s663_s7, %s664_s8  }
  0x4a   : > { %196 = sbr.rel (%p810_p12) target bundleno = 316 (0x13c), region = 28  ;;  %s850_s4 = sand.u32 (!%p810_p12), 1, %s644_s10  }
  0x4b   : > { %s436_s6 = sshll.u32 (!%p810_p12), %s850_s4, 5  ;;  %s199_s29 = scalar_lea.sflag (!%p810_p12), [#allocation4], %s850_s4 }
  0x4c   : > { %s202_s5 = scalar_lea.vmem (!%p810_p12), [#allocation3], %s436_s6  ;;  %p929_p8 = scmp.ne.s32.totalorder (!%p810_p12), %s923_s21, 0 }
  0x51   : > { %627 = dma.done.wait (%p929_p8), %s199_s29, 512  }
  0x52   : > { %629 = vsyncadd (%p929_p8), %s199_s29, 4294966784  ;;  %s208_s25 = scalar_lea.sflag [#allocation7], %s850_s4  ;;  %s211_s7 = scalar_lea.vmem [#allocation6], %s436_s6 }
  0x53   : > { %631 = dma.done.wait (%p929_p8), %s208_s25, 512  }
  0x54   : > { %633 = vsyncadd (%p929_p8), %s208_s25, 4294966784  ;;  %v249_v0 = vld [vmem:[%s202_s5] sm:$0xff]  ;;  %v250_v1 = vld [vmem:[%s202_s5 + $0x8] sm:$0xff]  ;;  %s235_s21 = scalar_lea.vmem [#allocation8], %s850_s4  ;;  %s438_s18 = sshll.u32 %s652_s12, 4 }
  0x55   : > { %v251_v2 = vld [vmem:[%s202_s5 + $0x10] sm:$0xff]  ;;  %v252_v3 = vld [vmem:[%s202_s5 + $0x18] sm:$0xff]  ;;  %v253_v4 = vld [vmem:[%s211_s7] sm:$0xff]  ;;  %s316_s8 = sshll.u32 %s235_s21, 4  ;;  %s870_s3 = scalar_lea.hbm %s919_s2, %s438_s18  ;;  %s865_s8 = int_to_ptr.vmem [resolvable:$true] %s316_s8 }
  0x56   : > { %v254_v5 = vld [vmem:[%s211_s7 + $0x8] sm:$0xff]  ;;  %v255_v6 = vld [vmem:[%s211_s7 + $0x10] sm:$0xff]  ;;  %v256_v7 = vld [vmem:[%s211_s7 + $0x18] sm:$0xff]  ;;  %v257_v8 = vsub.f32 %v249_v0, %v253_v4  ;;  %s303_s15 = scalar_lea.sflag [#allocation5], %s850_s4  ;;  %s574_s26 = scalar_lea.vmem %s865_s8, 16 }
  0x57   : > { %v258_v9 = vsub.f32 %v250_v1, %v254_v5  ;;  %v259_v10 = vsub.f32 %v251_v2, %v255_v6  ;;  %v260_v11 = vsub.f32 %v252_v3, %v256_v7  ;;  %p575_p0 = scmp.ne.s32.totalorder %s865_s8, %s574_s26  ;;  %p930_p3 = scmp.ne.s32.totalorder %s924_s22, 0 }
  0x58   : > { %v261_v12 = vmul.f32 %v257_v8, %v257_v8  ;;  %s666_s12 = smov [#allocation8]  }
  0x59   : > { %v262_v13 = vmul.f32 %v258_v9, %v258_v9  ;;  %v263_v14 = vmul.f32 %v259_v10, %v259_v10  ;;  %v264_v15 = vmul.f32 %v260_v11, %v260_v11  ;;  %p576_p12 = pnand %p575_p0, %p930_p3  ;;  %s578_s16 = sshll.u32 %s666_s12, 4  ;;  %s579_s16 = int_to_ptr.vmem [resolvable:$false] %s578_s16 }
  0x5a   : > { %s580_s20 = scalar_lea.vmem %s579_s16, 32  ;;  %p581_p7 = scmp.lt.s32.totalorder %s865_s8, %s579_s16 }
  0x5b   : > { %v288_v16 = vadd.f32 %v262_v13, %v261_v12  ;;  %p577_p13 = pneg %p576_p12  ;;  %p582_p10 = scmp.lt.s32.totalorder %s580_s20, %s574_s26 }
  0x5d   : > { %v289_v17 = vadd.f32 %v288_v16, %v263_v14  ;;  %p583_p9 = por %p582_p10, %p581_p7 }
  0x5f   : > { %v290_v18 = vadd.f32 %v289_v17, %v264_v15  ;;  %p584_p11 = pnand %p583_p9, %p577_p13 }
  0x61   : > { %291 = vadd.xlane.f32.xlu0 %v290_v18 }
  0xee   : > { %v292_v19 = vpop.xlane.xlu0 %291 }
  0xef   : > { %v293_v20 = vrot.slane %v292_v19, 4 }
  0xf1   : > { %v294_v21 = vadd.f32 %v293_v20, %v292_v19 }
  0xf3   : > { %v295_v22 = vrot.slane %v294_v21, 2 }
  0xf5   : > { %v296_v23 = vadd.f32 %v295_v22, %v294_v21 }
  0xf7   : > { %v297_v24 = vrot.slane %v296_v23, 1 }
  0xf9   : > { %v298_v25 = vadd.f32 %v297_v24, %v296_v23 }
  0xfb   : > { %443 = vpush %v298_v25 }
 0x12c   : > { %s444_s19 = spop %443 }
 0x12d   : > { %v300_v26 = vstv %s444_s19 }
 0x12e   : > { %301 = vst [vmem:[%s235_s21] sm:$0x1] %v300_v26 }
 0x12f   : > { %587 = shalt.err (!%p584_p11)
}
 0x130   : > { %s588_s27 = scalar_lea.hbm %s870_s3, 16  ;;  %s592_s29 = scalar_lea.hbm %s919_s2, 32 }
 0x131   : > { %p589_p1 = scmp.ne.s32.totalorder %s870_s3, %s588_s27  ;;  %p593_p5 = scmp.lt.u32.totalorder %s870_s3, %s919_s2 }
 0x132   : > { %p594_p4 = scmp.lt.u32.totalorder %s592_s29, %s588_s27  ;;  %p596_p0 = scmp.lt.u32.totalorder %s588_s27, %s870_s3 }
 0x133   : > { %p590_p6 = pnand %p589_p1, %p930_p3 }
 0x134   : > { %p595_p8 = por %p594_p4, %p593_p5 }
 0x135   : > { %p591_p2 = pneg %p590_p6 }
 0x136   : > { %p597_p12 = por %p596_p0, %p595_p8 }
 0x138   : > { %p598_p13 = pnand %p597_p12, %p591_p2 }
 0x13a   : > { %601 = shalt.err (!%p598_p13)
}
 0x13b   : > { %449 = dma.vmem_to_hbm [thread:$0]  (%p930_p3), %s865_s8, 16, %s870_s3, %s303_s15  }
 0x13c PF: > { %s328_s7 = sand.u32 1, %s640_s9   ;;  %p931_p7 = scmp.ne.s32.totalorder %s925_s24, 0 }
 0x13d   : > { %p932_p10 = scmp.ge.s32.totalorder %s660_s14, 2  ;;  %s329_s21 = scalar_lea.sflag [#allocation5], %s328_s7 }
 0x13f   : > { %p459_p9 = pnand %p932_p10, %p931_p7 }
 0x141   : > { %635 = dma.done.wait (!%p459_p9), %s329_s21, 16  }
 0x142   : > { %637 = vsyncadd (!%p459_p9), %s329_s21, 4294967280  ;;  %s21_s14 = sadd.s32 1, %s660_s14   ;;  %s933_s9 = smov %s644_s10 }
 0x143   : > { %p18_p11 = scmp.ge.s32.totalorder %s21_s14, 4   ;;  %s934_s10 = smov %s648_s11 }
 0x144   : > { %s935_s11 = smov %s738_s23  ;;  %s936_s12 = smov %s656_s13 }
 0x145   : > { %s937_s13 = smov %s939_s17  ;;  %20 = sbr.rel (!%p18_p11) target bundleno = 8 (0x8), region = 94 }
 0x14c   :  { %333 = vsyncpa [#allocation4], 1 }
 0x14d   :  { %335 = vsyncpa [#allocation4 + $0x1], 1 }
 0x14e   :  { %336 = vsyncpa [#allocation7], 1 }
 0x14f   :  { %338 = vsyncpa [#allocation7 + $0x1], 1 }
 0x150   :  { %339 = vsyncpa [#allocation5], 1 }
 0x151   :  { %341 = vsyncpa [#allocation5 + $0x1], 1 }

</bundles_post_ra>
